<compile_context>
chip_gen: v7x
topology: tpu7x:2x2x1
jax: 0.10.0
libtpu: 0.0.40
codegen_flags: <defaults>
</compile_context>

<pallas_src>
import functools

import jax
import jax.numpy as jnp
from jax.experimental import pallas as pl
from jax.experimental.pallas import tpu as pltpu

# ---------------- model config (matches IrisNetwork(n_layers=3, sub=1)) -----
N_LAYERS = 3
SUB = 1
IN_FEATURES = 4
NUM_CLASSES = 3

LANE = 128          # hidden dims padded to TPU lane width (params only)
SUBLANE = 8         # batch padded to a multiple of this
BATCH_TILE = 4096   # max rows per grid step


def _layer_dims(n_layers, sub):
    """Reproduce the (in, out) dims that IrisNetwork.__init__ builds."""
    dims = []
    start = IN_FEATURES
    for i in range(1, n_layers + 1):
        out = start - sub
        if i < n_layers:
            dims.append((start, out))
            start = out
        else:
            dims.append((start, NUM_CLASSES))
    return dims


def _round_up(x, m):
    return ((x + m - 1) // m) * m


# ----------------------------- Pallas kernel --------------------------------
def _mlp_kernel(x_ref, w0_ref, wr_ref, b_ref, o_ref, *, n_layers, num_classes):
    # x_ref : (tb, IN_FEATURES) f32   -- only real input bytes hit HBM
    # w0_ref: (IN_FEATURES, LANE) f32 -- first-layer weight, pre-padded
    # wr_ref: (L-1, LANE, LANE) f32   -- remaining weights, pre-padded
    # b_ref : (L, 1, LANE) f32        -- biases, pre-padded
    # o_ref : (tb, NUM_CLASSES) f32
    #
    # Layer 0: K=IN_FEATURES matmul performs the 4 -> 128 widening on the MXU.
    z = jnp.dot(x_ref[...], w0_ref[...],
                preferred_element_type=jnp.float32) + b_ref[0]
    for i in range(1, n_layers):                 # static python loop (unrolled)
        h = jnp.maximum(z, 0.0)                  # ReLU
        z = jnp.dot(h, wr_ref[i - 1],
                    preferred_element_type=jnp.float32) + b_ref[i]

    # Softmax restricted to the first `num_classes` (real) columns; padded
    # lanes are masked to -inf -> exp == 0, so they never enter the sum.
    col = jax.lax.broadcasted_iota(jnp.int32, z.shape, 1)
    z = jnp.where(col < num_classes, z, -jnp.inf)
    m = jnp.max(z, axis=-1, keepdims=True)
    e = jnp.exp(z - m)
    s = jnp.sum(e, axis=-1, keepdims=True)
    p = e / s        # exact normalization: kernel is DMA-bound, EUP approx buys nothing
    o_ref[...] = p[:, :num_classes].astype(o_ref.dtype)


# ------------------------- parameter prep (run ONCE) -------------------------
def prepare_iris_params(weights, biases):
    """Pad + stack the per-layer params once, at init time.

    weights[i]: (in_i, out_i) float32 (PyTorch weight transposed)
    biases[i]:  (out_i,) float32
    Returns (w_first f32 (IN_FEATURES,128), w_rest f32 (L-1,128,128),
             b_stack f32 (L,1,128)).  All kept in float32: with constant
    index_maps they are VMEM-resident, so bf16 would save no HBM bytes.
    """
    n_layers = len(weights)
    din0, dout0 = weights[0].shape
    w_first = jnp.zeros((IN_FEATURES, LANE), jnp.float32)
    w_first = w_first.at[:din0, :dout0].set(weights[0])

    w_rest = jnp.zeros((max(n_layers - 1, 1), LANE, LANE), jnp.float32)
    b_stack = jnp.zeros((n_layers, 1, LANE), jnp.float32)
    b_stack = b_stack.at[0, 0, :dout0].set(biases[0])
    for i in range(1, n_layers):
        din, dout = weights[i].shape
        w_rest = w_rest.at[i - 1, :din, :dout].set(weights[i])
        b_stack = b_stack.at[i, 0, :dout].set(biases[i])
    return w_first, w_rest, b_stack


# ------------------------------ wrapper (per call) ----------------------------
def iris_network_pallas(x, w_first, w_rest, b_stack, *, batch_tile=BATCH_TILE):
    """x: (B, IN_FEATURES) float32. Params from prepare_iris_params.
    Returns (B, NUM_CLASSES) softmax probabilities (float32)."""
    n_layers = b_stack.shape[0]
    B, F = x.shape
    assert F == IN_FEATURES

    # Batch padded to a sublane multiple only.  Tile choice:
    #  - per-step rows <= batch_tile,
    #  - >= 2 grid steps when the batch allows it (keeps both v7x TCs busy),
    #  - padding bounded by SUBLANE rows per step (no double round-up).
    Bp8 = _round_up(B, SUBLANE)
    n_steps = max(1, pl.cdiv(Bp8, batch_tile))
    if n_steps == 1 and Bp8 >= 2 * SUBLANE:
        n_steps = 2
    tb = _round_up(pl.cdiv(Bp8, n_steps), SUBLANE)
    Bp = n_steps * tb

    x_pad = jnp.pad(x.astype(jnp.float32), ((0, Bp - B), (0, 0)))

    kernel = functools.partial(
        _mlp_kernel, n_layers=n_layers, num_classes=NUM_CLASSES
    )
    wr_layers = w_rest.shape[0]

    out = pl.pallas_call(
        kernel,
        out_shape=jax.ShapeDtypeStruct((Bp, NUM_CLASSES), jnp.float32),
        grid=(n_steps,),
        in_specs=[
            # (tb, 4): last dim equals the full array dim -> legal block.
            pl.BlockSpec((tb, IN_FEATURES), lambda i: (i, 0)),
            # constant block indices -> params stay VMEM-resident across steps
            pl.BlockSpec((IN_FEATURES, LANE), lambda i: (0, 0)),
            pl.BlockSpec((wr_layers, LANE, LANE), lambda i: (0, 0, 0)),
            pl.BlockSpec((n_layers, 1, LANE), lambda i: (0, 0, 0)),
        ],
        # (tb, 3): full last dim -> one contiguous tb*12 B DMA per step.
        out_specs=pl.BlockSpec((tb, NUM_CLASSES), lambda i: (i, 0)),
        compiler_params=pltpu.CompilerParams(
            dimension_semantics=("parallel",)),   # shards rows across v7x TCs
    )(x_pad, w_first, w_rest, b_stack)

    return out[:B]


# ----------------------------- reference (pure JAX) --------------------------
def iris_network_ref(x, weights, biases):
    h = x
    for i, (w, b) in enumerate(zip(weights, biases)):
        h = h @ w + b
        if i < len(weights) - 1:
            h = jnp.maximum(h, 0.0)
        else:
            h = jax.nn.softmax(h, axis=1)
    return h


# ----------------------------------- main ------------------------------------
if __name__ == "__main__":
    key = jax.random.PRNGKey(0)

    dims = _layer_dims(N_LAYERS, SUB)   # [(4,3), (3,2), (2,3)]

    # Deterministic init mimicking nn.Linear default: U(-1/sqrt(in), 1/sqrt(in))
    weights, biases = [], []
    for (din, dout) in dims:
        key, kw, kb = jax.random.split(key, 3)
        bound = 1.0 / jnp.sqrt(jnp.float32(din))
        # stored as (in, out) == PyTorch weight (out, in) transposed
        weights.append(jax.random.uniform(kw, (din, dout), jnp.float32,
                                          -bound, bound))
        biases.append(jax.random.uniform(kb, (dout,), jnp.float32,
                                         -bound, bound))

    # Padding/stacking hoisted here: happens once, not per inference call.
    w_first, w_rest, b_stack = prepare_iris_params(weights, biases)

    key, kx = jax.random.split(key)
    B = 8
    x = jax.random.normal(kx, (B, IN_FEATURES), jnp.float32)

    out = iris_network_pallas(x, w_first, w_rest, b_stack)
    out = jax.block_until_ready(out)

    ref = iris_network_ref(x, weights, biases)
    assert out.shape == (B, NUM_CLASSES)
    # f32 params + exact normalization -> tight tolerances (only MXU bf16-pass
    # rounding differences vs the XLA reference remain).
    assert jnp.allclose(out, ref, atol=5e-3, rtol=1e-3), (out, ref)
    assert jnp.allclose(jnp.sum(out, axis=1), 1.0, atol=1e-5)

    print("KERNEL_OK")
</pallas_src>

<mosaic_0001>
module attributes {stable_mosaic.version = 11 : i64} {
  func.func @_mlp_kernel(%arg0: i32, %arg1: memref<8x4xf32, #tpu.memory_space<vmem>>, %arg2: memref<4x128xf32, #tpu.memory_space<vmem>>, %arg3: memref<2x128x128xf32, #tpu.memory_space<vmem>>, %arg4: memref<3x1x128xf32, #tpu.memory_space<vmem>>, %arg5: memref<8x3xf32, #tpu.memory_space<vmem>>) attributes {dimension_semantics = [#tpu.dimension_semantics<parallel>], iteration_bounds = array<i64: 1>, scalar_prefetch = 0 : i64, scratch_operands = 0 : i64, tpu.core_type = #tpu.core_type<tc>, window_params = [{transform_indices = @transform_0, window_bounds = array<i64: 8, 4>}, {pipeline_mode = #tpu.pipeline_mode<synchronous>, transform_indices = @transform_1, window_bounds = array<i64: 4, 128>}, {pipeline_mode = #tpu.pipeline_mode<synchronous>, transform_indices = @transform_2, window_bounds = array<i64: 2, 128, 128>}, {pipeline_mode = #tpu.pipeline_mode<synchronous>, transform_indices = @transform_3, window_bounds = array<i64: 3, 1, 128>}, {transform_indices = @transform_4, window_bounds = array<i64: 8, 3>}]} {
    %c0 = arith.constant 0 : index
    %c0_0 = arith.constant 0 : index
    %0 = vector.load %arg1[%c0, %c0_0] : memref<8x4xf32, #tpu.memory_space<vmem>>, vector<8x4xf32>
    %c0_1 = arith.constant 0 : index
    %c0_2 = arith.constant 0 : index
    %1 = vector.load %arg2[%c0_1, %c0_2] : memref<4x128xf32, #tpu.memory_space<vmem>>, vector<4x128xf32>
    %cst = arith.constant dense<0.000000e+00> : vector<8x128xf32>
    %2 = tpu.matmul %0, %1, %cst {dimension_numbers = #tpu.dot_dimension_numbers<[1], [0], [0], [1], [0, 0, 1, 1], [], []>} : vector<8x4xf32>, vector<4x128xf32>, vector<8x128xf32> -> vector<8x128xf32>
    %c0_3 = arith.constant 0 : index
    %c0_4 = arith.constant 0 : index
    %c0_5 = arith.constant 0 : index
    %3 = vector.load %arg4[%c0_3, %c0_4, %c0_5] : memref<3x1x128xf32, #tpu.memory_space<vmem>>, vector<1x1x128xf32>
    %4 = vector.shape_cast %3 : vector<1x1x128xf32> to vector<1x128xf32>
    %5 = vector.broadcast %4 : vector<1x128xf32> to vector<8x128xf32>
    %6 = arith.addf %2, %5 : vector<8x128xf32>
    %cst_6 = arith.constant 0.000000e+00 : f32
    %7 = vector.broadcast %cst_6 : f32 to vector<8x128xf32>
    %8 = arith.maximumf %6, %7 : vector<8x128xf32>
    %c0_7 = arith.constant 0 : index
    %c0_8 = arith.constant 0 : index
    %c0_9 = arith.constant 0 : index
    %9 = vector.load %arg3[%c0_7, %c0_8, %c0_9] : memref<2x128x128xf32, #tpu.memory_space<vmem>>, vector<1x128x128xf32>
    %10 = vector.shape_cast %9 : vector<1x128x128xf32> to vector<128x128xf32>
    %cst_10 = arith.constant dense<0.000000e+00> : vector<8x128xf32>
    %11 = tpu.matmul %8, %10, %cst_10 {dimension_numbers = #tpu.dot_dimension_numbers<[1], [0], [0], [1], [0, 0, 1, 1], [], []>} : vector<8x128xf32>, vector<128x128xf32>, vector<8x128xf32> -> vector<8x128xf32>
    %c1 = arith.constant 1 : index
    %c0_11 = arith.constant 0 : index
    %c0_12 = arith.constant 0 : index
    %12 = vector.load %arg4[%c1, %c0_11, %c0_12] : memref<3x1x128xf32, #tpu.memory_space<vmem>>, vector<1x1x128xf32>
    %13 = vector.shape_cast %12 : vector<1x1x128xf32> to vector<1x128xf32>
    %14 = vector.broadcast %13 : vector<1x128xf32> to vector<8x128xf32>
    %15 = arith.addf %11, %14 : vector<8x128xf32>
    %cst_13 = arith.constant 0.000000e+00 : f32
    %16 = vector.broadcast %cst_13 : f32 to vector<8x128xf32>
    %17 = arith.maximumf %15, %16 : vector<8x128xf32>
    %c1_14 = arith.constant 1 : index
    %c0_15 = arith.constant 0 : index
    %c0_16 = arith.constant 0 : index
    %18 = vector.load %arg3[%c1_14, %c0_15, %c0_16] : memref<2x128x128xf32, #tpu.memory_space<vmem>>, vector<1x128x128xf32>
    %19 = vector.shape_cast %18 : vector<1x128x128xf32> to vector<128x128xf32>
    %cst_17 = arith.constant dense<0.000000e+00> : vector<8x128xf32>
    %20 = tpu.matmul %17, %19, %cst_17 {dimension_numbers = #tpu.dot_dimension_numbers<[1], [0], [0], [1], [0, 0, 1, 1], [], []>} : vector<8x128xf32>, vector<128x128xf32>, vector<8x128xf32> -> vector<8x128xf32>
    %c2 = arith.constant 2 : index
    %c0_18 = arith.constant 0 : index
    %c0_19 = arith.constant 0 : index
    %21 = vector.load %arg4[%c2, %c0_18, %c0_19] : memref<3x1x128xf32, #tpu.memory_space<vmem>>, vector<1x1x128xf32>
    %22 = vector.shape_cast %21 : vector<1x1x128xf32> to vector<1x128xf32>
    %23 = vector.broadcast %22 : vector<1x128xf32> to vector<8x128xf32>
    %24 = arith.addf %20, %23 : vector<8x128xf32>
    %25 = tpu.iota {dimensions = array<i32: 1>} : vector<8x128xi32>
    %c3_i32 = arith.constant 3 : i32
    %26 = vector.broadcast %c3_i32 : i32 to vector<8x128xi32>
    %27 = arith.cmpi slt, %25, %26 : vector<8x128xi32>
    %cst_20 = arith.constant 0xFF800000 : f32
    %28 = vector.broadcast %cst_20 : f32 to vector<8x128xf32>
    %29 = arith.select %27, %24, %28 : vector<8x128xi1>, vector<8x128xf32>
    %cst_21 = arith.constant dense<0xFF800000> : vector<8xf32>
    %30 = vector.multi_reduction <maximumf>, %29, %cst_21 [1] : vector<8x128xf32> to vector<8xf32>
    %31 = vector.shape_cast %30 : vector<8xf32> to vector<8x1xf32>
    %32 = vector.broadcast %31 : vector<8x1xf32> to vector<8x128xf32>
    %33 = arith.subf %29, %32 : vector<8x128xf32>
    %34 = math.exp %33 : vector<8x128xf32>
    %cst_22 = arith.constant dense<0.000000e+00> : vector<8xf32>
    %35 = vector.multi_reduction <add>, %34, %cst_22 [1] : vector<8x128xf32> to vector<8xf32>
    %36 = vector.shape_cast %35 : vector<8xf32> to vector<8x1xf32>
    %37 = vector.broadcast %36 : vector<8x1xf32> to vector<8x128xf32>
    %38 = arith.divf %34, %37 : vector<8x128xf32>
    %39 = vector.extract_strided_slice %38 {offsets = [0, 0], sizes = [8, 3], strides = [1, 1]} : vector<8x128xf32> to vector<8x3xf32>
    %c0_23 = arith.constant 0 : index
    %c0_24 = arith.constant 0 : index
    %40 = vector.load %arg5[%c0_23, %c0_24] : memref<8x3xf32, #tpu.memory_space<vmem>>, vector<8x3xf32>
    tpu.vector_store %arg5[%c0_23, %c0_24], %39 {strides = array<i32>} : memref<8x3xf32, #tpu.memory_space<vmem>>, vector<8x3xf32>,
    return
  }
  func.func @transform_0(%arg0: i32) -> (i32, i32) {
    %c0_i32 = arith.constant 0 : i32
    %c0_i32_0 = arith.constant 0 : i32
    return %arg0, %c0_i32 : i32, i32
  }
  func.func @transform_1(%arg0: i32) -> (i32, i32) {
    %c0_i32 = arith.constant 0 : i32
    %c0_i32_0 = arith.constant 0 : i32
    %c0_i32_1 = arith.constant 0 : i32
    return %c0_i32, %c0_i32_0 : i32, i32
  }
  func.func @transform_2(%arg0: i32) -> (i32, i32, i32) {
    %c0_i32 = arith.constant 0 : i32
    %c0_i32_0 = arith.constant 0 : i32
    %c0_i32_1 = arith.constant 0 : i32
    %c0_i32_2 = arith.constant 0 : i32
    return %c0_i32, %c0_i32_0, %c0_i32_1 : i32, i32, i32
  }
  func.func @transform_3(%arg0: i32) -> (i32, i32, i32) {
    %c0_i32 = arith.constant 0 : i32
    %c0_i32_0 = arith.constant 0 : i32
    %c0_i32_1 = arith.constant 0 : i32
    %c0_i32_2 = arith.constant 0 : i32
    return %c0_i32, %c0_i32_0, %c0_i32_1 : i32, i32, i32
  }
  func.func @transform_4(%arg0: i32) -> (i32, i32) {
    %c0_i32 = arith.constant 0 : i32
    %c0_i32_0 = arith.constant 0 : i32
    return %arg0, %c0_i32 : i32, i32
  }
}

</mosaic_0001>

<bundles_post_ra>
// kernel: tpu_custom_call.1
= control target key start
LH: loop header
LB: loop body
LE: loop exit
PB: predicated region body
PF: predicated region fallthrough
CT: control target
= control target key end

     0   :  { %9 = vsyncpa [#allocation3], 0  ;;  %s529_s15 = smov [#allocation2]   ;;  %s609_s0 = inlined_call_operand.vmem [shape: f32[8,4], index: 0, kind: input, shape index: {}]   ;;  %s610_s1 = inlined_call_operand.vmem [shape: f32[4,128], index: 1, kind: input, shape index: {}]   ;;  %s611_s2 = inlined_call_operand.hbm [shape: f32[2,128,128], index: 2, kind: input, shape index: {}]   ;;  %s612_s3 = inlined_call_operand.vmem [shape: f32[3,1,128], index: 3, kind: input, shape index: {}]   ;;  %s613_s4 = inlined_call_operand.vmem [shape: f32[8,3], index: 4, kind: output, shape index: {}]  }
   0x1   :  { %s19_s16 = sshll.u32 %s529_s15, 4  ;;  %s505_s19 = scalar_lea.hbm %s611_s2, 4096  ;;  %s20_s16 = int_to_ptr.vmem [resolvable:$true] %s19_s16 }
   0x2   :  { %p506_p0 = scmp.ne.s32.totalorder %s611_s2, %s505_s19  ;;  %p509_p1 = scmp.lt.u32.totalorder %s505_s19, %s611_s2 }
   0x4   :  { %p511_p2 = pnand %p509_p1, %p506_p0 }
   0x6   :  { %514 = shalt.err (!%p511_p2)
}
   0x7   :  { %s515_s24 = scalar_lea.vmem %s20_s16, 4096  ;;  %p520_p4 = scmp.lt.s32.totalorder %s20_s16, %s20_s16 }
   0x8   :  { %p516_p3 = scmp.ne.s32.totalorder %s20_s16, %s515_s24  ;;  %p521_p5 = scmp.lt.s32.totalorder %s515_s24, %s515_s24 }
   0xa   :  { %p522_p6 = por %p521_p5, %p520_p4 }
   0xc   :  { %p523_p7 = pnand %p522_p6, %p516_p3 }
   0xe   :  { %526 = shalt.err (!%p523_p7)
}
   0xf   :  { %s530_s25 = smov 128   ;;  %s531_s26 = smov 8  }
  0x10   :  { %25 = dma.hbm_to_vmem [thread:$0]  %s611_s2, 4096, %s20_s16, [#allocation3], %s530_s25, %s530_s25, %s531_s26  }
  0x11   :  { %527 = dma.done.wait [#allocation3], 4096  }
  0x12   :  { %528 = vsyncadd [#allocation3], 4294963200  ;;  %v532_v0 = vmov 0.0   ;;  %vm533_vm0 = vmmov 0   ;;  %v534_v1 = vmov 0.0|0.0   ;;  %vm44_vm1 = vcmask 1043456  }
  0x13   :  { %372 = vmatprep.subr.mxu0 %v532_v0  ;;  %374 = vmatprep.mubr.msk.f32.mxu0 %vm533_vm0, %v532_v0  ;;  %vm40_vm2 = vcmask 31744   ;;  %v32_v2 = vld [vmem:[%s610_s1] sm:$0xf]  ;;  %v120_v5 = vld [vmem:[#allocation2 + $0x8] sm:$0xff]  ;;  %v121_v6 = vld [vmem:[#allocation2 + $0x10] sm:$0xff]  ;;  %v309_v62 = vlaneseq  ;;  %vm322_vm4 = vcmask 23552  }
  0x14   :  { %447 = vmatprep.subr.bf16.mxu1 %v534_v1  ;;  %409 = vmatprep.mubr.msk.f32.mxu1 %vm533_vm0, %v532_v0  ;;  %v31_v3 = vld [vmem:[%s609_s0] sm:$0xff]  ;;  %v122_v7 = vld [vmem:[#allocation2 + $0x18] sm:$0xff]  ;;  %v124_v11 = vld [vmem:[#allocation2 + $0x28] sm:$0xff] }
  0x15   :  { %v119_v4 = vld [vmem:[#allocation2] sm:$0xff]  ;;  %373 = vmatpush3.msk.msra.mxu0 %vm44_vm1, %v32_v2  ;;  %v451_v9 = vpack.c.bf16 %v122_v7, %v121_v6  ;;  %v125_v13 = vld [vmem:[#allocation2 + $0x30] sm:$0xff]  ;;  %v126_v14 = vld [vmem:[#allocation2 + $0x38] sm:$0xff]  ;;  %v310_v63 = vand.u32 127, %v309_v62 }
  0x16   :  { %375 = vmatmul.mubr.msk.f32.vlgmr.msra.gmra.mrb[0].mxu0 %vm40_vm2, %v31_v3  ;;  %v448_v8 = vpack.c.bf16 %v120_v5, %v119_v4  ;;  %471 = vmatprep.subr.bf16.mxu0 %v534_v1  ;;  %v123_v10 = vld [vmem:[#allocation2 + $0x20] sm:$0xff]  ;;  %v457_v15 = vpack.c.bf16 %v126_v14, %v125_v13  ;;  %v128_v17 = vld [vmem:[#allocation2 + $0x48] sm:$0xff]  ;;  %v129_v19 = vld [vmem:[#allocation2 + $0x50] sm:$0xff] }
  0x17   :  { %444 = vmatprep.mubr.msk.f32.mxu0 %vm533_vm0, %v532_v0  ;;  %v454_v12 = vpack.c.bf16 %v124_v11, %v123_v10  ;;  %v127_v16 = vld [vmem:[#allocation2 + $0x40] sm:$0xff]  ;;  %v130_v20 = vld [vmem:[#allocation2 + $0x58] sm:$0xff]  ;;  %v132_v23 = vld [vmem:[#allocation2 + $0x68] sm:$0xff]  ;;  %vm311_vm3 = vcmp.lt.s32.totalorder %v310_v63, 3 }
  0x18   :  { %449 = vmatpush3.bf16.msra.mxu1 %v448_v8  ;;  %v460_v18 = vpack.c.bf16 %v128_v17, %v127_v16  ;;  %v463_v21 = vpack.c.bf16 %v130_v20, %v129_v19  ;;  %v131_v22 = vld [vmem:[#allocation2 + $0x60] sm:$0xff]  ;;  %v133_v25 = vld [vmem:[#allocation2 + $0x70] sm:$0xff]  ;;  %v134_v26 = vld [vmem:[#allocation2 + $0x78] sm:$0xff] }
  0x19   :  { %450 = vmatprep.subr.bf16.mxu1 %v534_v1  ;;  %v466_v24 = vpack.c.bf16 %v132_v23, %v131_v22  ;;  %v469_v27 = vpack.c.bf16 %v134_v26, %v133_v25  ;;  %v215_v28 = vld [vmem:[#allocation2 + $0x80] sm:$0xff]  ;;  %v216_v29 = vld [vmem:[#allocation2 + $0x88] sm:$0xff]  ;;  %v217_v30 = vld [vmem:[#allocation2 + $0x90] sm:$0xff] }
  0x1a   :  { %v472_v31 = vpack.c.bf16 %v216_v29, %v215_v28  ;;  %v218_v32 = vld [vmem:[#allocation2 + $0x98] sm:$0xff]  ;;  %v219_v34 = vld [vmem:[#allocation2 + $0xa0] sm:$0xff]  ;;  %v220_v35 = vld [vmem:[#allocation2 + $0xa8] sm:$0xff] }
  0x1b   :  { %v475_v33 = vpack.c.bf16 %v218_v32, %v217_v30  ;;  %v478_v36 = vpack.c.bf16 %v220_v35, %v219_v34  ;;  %v221_v37 = vld [vmem:[#allocation2 + $0xb0] sm:$0xff]  ;;  %v222_v38 = vld [vmem:[#allocation2 + $0xb8] sm:$0xff]  ;;  %v223_v40 = vld [vmem:[#allocation2 + $0xc0] sm:$0xff] }
  0x1c   :  { %452 = vmatpush3.bf16.msra.mxu1 %v451_v9  ;;  %473 = vmatpush3.bf16.msra.mxu0 %v472_v31  ;;  %v481_v39 = vpack.c.bf16 %v222_v38, %v221_v37  ;;  %v224_v41 = vld [vmem:[#allocation2 + $0xc8] sm:$0xff]  ;;  %v225_v43 = vld [vmem:[#allocation2 + $0xd0] sm:$0xff]  ;;  %v226_v44 = vld [vmem:[#allocation2 + $0xd8] sm:$0xff] }
  0x1d   :  { %453 = vmatprep.subr.bf16.mxu1 %v534_v1  ;;  %474 = vmatprep.subr.bf16.mxu0 %v534_v1  ;;  %v484_v42 = vpack.c.bf16 %v224_v41, %v223_v40  ;;  %v487_v45 = vpack.c.bf16 %v226_v44, %v225_v43  ;;  %v227_v46 = vld [vmem:[#allocation2 + $0xe0] sm:$0xff]  ;;  %v228_v47 = vld [vmem:[#allocation2 + $0xe8] sm:$0xff]  ;;  %v229_v54 = vld [vmem:[#allocation2 + $0xf0] sm:$0xff] }
  0x1e   :  { %v490_v48 = vpack.c.bf16 %v228_v47, %v227_v46  ;;  %v329_v49 = vld [vmem:[%s612_s3] ss:$0 sm:$0xff]  ;;  %v230_v55 = vld [vmem:[#allocation2 + $0xf8] sm:$0xff]  ;;  %v333_v57 = vld [vmem:[%s612_s3 + $0x1] ss:$0 sm:$0xff] }
  0x1f   :  { %v493_v56 = vpack.c.bf16 %v230_v55, %v229_v54  ;;  %v335_v0 = vld [vmem:[%s612_s3 + $0x2] ss:$0 sm:$0xff] }
  0x20   :  { %455 = vmatpush3.bf16.msra.mxu1 %v454_v12  ;;  %476 = vmatpush3.bf16.msra.mxu0 %v475_v33 }
  0x21   :  { %456 = vmatprep.subr.bf16.mxu1 %v534_v1  ;;  %477 = vmatprep.subr.bf16.mxu0 %v534_v1 }
  0x24   :  { %458 = vmatpush3.bf16.msra.mxu1 %v457_v15  ;;  %479 = vmatpush3.bf16.msra.mxu0 %v478_v36 }
  0x25   :  { %459 = vmatprep.subr.bf16.mxu1 %v534_v1  ;;  %480 = vmatprep.subr.bf16.mxu0 %v534_v1 }
  0x28   :  { %461 = vmatpush3.bf16.msra.mxu1 %v460_v18  ;;  %482 = vmatpush3.bf16.msra.mxu0 %v481_v39 }
  0x29   :  { %462 = vmatprep.subr.bf16.mxu1 %v534_v1  ;;  %483 = vmatprep.subr.bf16.mxu0 %v534_v1 }
  0x2c   :  { %464 = vmatpush3.bf16.msra.mxu1 %v463_v21  ;;  %485 = vmatpush3.bf16.msra.mxu0 %v484_v42 }
  0x2d   :  { %465 = vmatprep.subr.bf16.mxu1 %v534_v1  ;;  %486 = vmatprep.subr.bf16.mxu0 %v534_v1 }
  0x30   :  { %467 = vmatpush3.bf16.msra.mxu1 %v466_v24  ;;  %488 = vmatpush3.bf16.msra.mxu0 %v487_v45 }
  0x31   :  { %468 = vmatprep.subr.bf16.mxu1 %v534_v1  ;;  %489 = vmatprep.subr.bf16.mxu0 %v534_v1 }
  0x34   :  { %470 = vmatpush3.bf16.msra.mxu1 %v469_v27  ;;  %491 = vmatpush3.bf16.msra.mxu0 %v490_v48 }
  0x35   :  { %492 = vmatprep.subr.bf16.mxu0 %v534_v1 }
  0x38   :  { %494 = vmatpush3.bf16.msra.mxu0 %v493_v56 }
  0xe9   :  { %v114_v50 = vpop.f32.mrb[0].mxu0 }
  0xea   :  { %v115_v51 = vadd.f32 %v329_v49, %v114_v50  ;;  %v376_v52 = vpop.f32.mrb[1].mxu0 }
  0xec   :  { %v118_v53 = vmax.f32 %v115_v51, 0.0 }
  0xee   :  { %410 = vmatmul.mubr.f32.vlgmr.msra.gmra.mrb[0].mxu1 %v118_v53 }
 0x1c1   :  { %v209_v58 = vpop.f32.mrb[0].mxu1 }
 0x1c2   :  { %v210_v59 = vadd.f32 %v333_v57, %v209_v58  ;;  %v411_v60 = vpop.f32.mrb[1].mxu1 }
 0x1c4   :  { %v213_v61 = vmax.f32 %v210_v59, 0.0 }
 0x1c6   :  { %445 = vmatmul.mubr.f32.vlgmr.msra.gmra.mrb[2].mxu0 %v213_v61 }
 0x299   :  { %v305_v1 = vpop.f32.mrb[2].mxu0 }
 0x29a   :  { %v306_v2 = vadd.f32 %v335_v0, %v305_v1  ;;  %v446_v3 = vpop.f32.mrb[3].mxu0 }
 0x29c   :  { %v312_v4 = vsel %vm311_vm3, %v306_v2, -inf }
 0x29d   :  { %313 = vmax.xlane.f32.xlu0 %v312_v4 }
 0x32a   :  { %v314_v5 = vpop.xlane.xlu0 %313 }
 0x32b   :  { %v315_v6 = vsub.f32 %v312_v4, %v314_v5 }
 0x32d   :  { %v316_v7 = vmul.f32 1.442695, %v315_v6 }
 0x32f   :  { %501 = vpow2.f32 %v316_v7 }
 0x339   :  { %v502_v8 = vpop.eup %501 }
 0x33a   :  { %318 = vadd.xlane.f32.xlu0 %v502_v8 }
 0x3c7   :  { %v319_v9 = vpop.xlane.xlu0 %318 }
 0x3c8   :  { %503 = vrcp.f32 %v319_v9 }
 0x3d2   :  { %v504_v10 = vpop.eup %503 }
 0x3d3   :  { %v321_v11 = vmul.f32 %v504_v10, %v502_v8 }
 0x3d5   :  { %323 = vst.msk [vmem:[%s613_s4] sm:$0xff] %vm322_vm4, %v321_v11 }
 0x3d6   :  { %328 = vsyncpa [#allocation3], 1 }

</bundles_post_ra>
